<compile_context>
chip_gen: v5e
topology: v5e:2x2
jax: 0.10.0
libtpu: 0.0.40
codegen_flags: <defaults>
</compile_context>

<pallas_src>
import math

import jax
import jax.numpy as jnp
from jax import lax
from jax.experimental import pallas as pl
from jax.experimental.pallas import tpu as pltpu

_SQRT_2 = math.sqrt(2.0)
_INV_SQRT_2 = 1.0 / math.sqrt(2.0)
_INV_SQRT_2PI = 1.0 / math.sqrt(2.0 * math.pi)
_PHI_C = 1.0 / (2.0 * math.sqrt(math.pi))          # = phi(alpha)/sqrt(2) scale
_A_CONST = (945.0 / 4.0) ** (1.0 / 7.0)             # a = _A_CONST * sigma_sq**(3/7)


def _triweight_attention_kernel(row_ref, basis_ref, out_ref):
    """r[n, j] = E_{triweight(mu_n, a_n)}[ N(t; mu_j, sigma_j^2) ].

    row_ref:   (tn, 4)  columns = [mu, a, a^2, c]      (precomputed per row)
    basis_ref: (8, tb)  rows = [psi_mu, -1/(s*sqrt2), -6*sh, -3*sh^2, 2*sh^3,
                                3*sh^4, -6*sh^5, -sh^6]  with sh = s*sqrt(2)
    """
    rp = row_ref[...]                            # (tn, 4)
    mu = rp[:, 0:1]                              # (tn, 1)
    a = rp[:, 1:2]
    aa2 = rp[:, 2:3]
    c = rp[:, 3:4]

    bp = basis_ref[...]                          # (8, tb)
    pm = bp[0:1, :]                              # psi means
    neg_inv_sh = bp[1:2, :]                      # -1/(s*sqrt2)
    sn6 = bp[2:3, :]                             # -6 sh
    s2n3 = bp[3:4, :]                            # -3 sh^2
    s3x2 = bp[4:5, :]                            #  2 sh^3
    s4x3 = bp[5:6, :]                            #  3 sh^4
    s5n6 = bp[6:7, :]                            # -6 sh^5
    s6n = bp[7:8, :]                             # -  sh^6

    # ---- hot (tn, tb) path --------------------------------------------------
    m = pm - mu                                  # (tn, tb)
    # u = alpha/sqrt2, v = beta/sqrt2 with alpha = -(a+m)/s, beta = (a-m)/s
    u = (a + m) * neg_inv_sh
    v = (m - a) * neg_inv_sh

    # p = phi/sqrt2 -> scaled moments j_k = i_k / 2^(k/2):
    #   j_0 = 0.5*(erf(v)-erf(u)),  j_1 = p_a - p_b,
    #   j_k = ((k-1)/2) j_{k-2} + u^{k-1} p_a - v^{k-1} p_b
    # and the i_k coefficients use sh^k = (s*sqrt2)^k instead of s^k.
    p_a = _PHI_C * jnp.exp(-(u * u))
    p_b = _PHI_C * jnp.exp(-(v * v))
    i0 = 0.5 * (lax.erf(v) - lax.erf(u))
    i1 = p_a - p_b

    # r / c = int_{-a}^{a} (a^2 - t^2)^3 N(t; m, s^2) dt, with D = a^2 - m^2:
    #   z^0: D^3            z^1: -6 m s D^2         z^2: 3 s^2 D (4m^2 - D)
    #   z^3: 2 m s^3(6D-4m^2) z^4: 3 s^4 (D-4m^2)   z^5: -6 m s^5   z^6: -s^6
    m2 = m * m
    D = aa2 - m2
    E = D - 4.0 * m2
    D2 = D * D

    acc = (D2 * D) * i0                          # D^3 j0
    acc = acc + (sn6 * (m * D2)) * i1            # -6 m sh D^2 j1

    pa = u * p_a
    pb = v * p_b
    i2 = 0.5 * i0 + (pa - pb)
    acc = acc + (s2n3 * (D * E)) * i2            # -3 sh^2 D (D - 4m^2) j2

    pa = u * pa
    pb = v * pb
    i3 = i1 + (pa - pb)
    acc = acc + (s3x2 * (m * (5.0 * D + E))) * i3  # 2 m sh^3 (6D - 4m^2) j3

    pa = u * pa
    pb = v * pb
    i4 = 1.5 * i2 + (pa - pb)
    acc = acc + (s4x3 * E) * i4                  #  3 sh^4 (D - 4m^2) j4

    pa = u * pa
    pb = v * pb
    i5 = 2.0 * i3 + (pa - pb)
    acc = acc + (s5n6 * m) * i5                  # -6 m sh^5 j5

    pa = u * pa
    pb = v * pb
    i6 = 2.5 * i4 + (pa - pb)
    acc = acc + s6n * i6                         # -  sh^6 j6

    out_ref[...] = (c * acc).astype(out_ref.dtype)


def _round_up(x, m):
    return (x + m - 1) // m * m


def _cdiv(a, b):
    return -(-a // b)


def continuous_triweight_pallas(theta, psi_mu, psi_sigma, *,
                                max_tile_n=256, max_tile_b=512):
    """theta: [N, 2]; psi_mu, psi_sigma: [B] -> r: [N, B] (float32)."""
    theta = jnp.asarray(theta, jnp.float32)
    psi_mu = jnp.asarray(psi_mu, jnp.float32)
    psi_sigma = jnp.asarray(psi_sigma, jnp.float32)
    n = theta.shape[0]
    b = psi_mu.shape[0]

    # -- rows: tile_n chosen so total row padding is < 8 ----------------------
    n8 = _round_up(n, 8)
    steps_n = _cdiv(n8, max_tile_n)
    tile_n = _round_up(_cdiv(n8, steps_n), 8)
    n_pad = steps_n * tile_n
    if n_pad != n:
        # valid dummy rows (theta2 = -0.5 -> sigma^2 = 1), sliced off below
        pad = jnp.zeros((n_pad - n, 2), jnp.float32).at[:, 1].set(-0.5)
        theta_p = jnp.concatenate([theta, pad], axis=0)
    else:
        theta_p = theta

    # per-row parameters, hoisted out of the kernel (tiny XLA op)
    # NOTE: theta[:, 1] >= 0 silently produces NaN (contract of the module).
    sigma_sq = -0.5 / theta_p[:, 1:2]
    mu = theta_p[:, 0:1] * sigma_sq
    a = _A_CONST * sigma_sq ** (3.0 / 7.0)                 # support half-width
    c = 1.0 / (216.0 * sigma_sq ** 3)                      # (1/(6 sigma^2))^3
    row_params = jnp.concatenate([mu, a, a * a, c], axis=1)  # (n_pad, 4)

    # -- basis: pad B to a multiple of 128 (lane-dense stores), tile it -------
    b_pad = _round_up(b, 128)
    q = b_pad // 128
    tile_b = 128
    for k in range(min(q, max_tile_b // 128), 0, -1):
        if q % k == 0:
            tile_b = 128 * k
            break

    s_pad = jnp.ones((b_pad,), jnp.float32).at[:b].set(psi_sigma)
    m_pad = jnp.zeros((b_pad,), jnp.float32).at[:b].set(psi_mu)
    sh = s_pad * _SQRT_2                                   # sqrt(2) folded in
    sh2 = sh * sh
    sh3 = sh2 * sh
    sh4 = sh2 * sh2
    basis_params = jnp.stack([
        m_pad,              # psi_mu
        -1.0 / sh,          # -1/(s*sqrt2)
        -6.0 * sh,          # coefficient scale for j1
        -3.0 * sh2,         # j2
        2.0 * sh3,          # j3
        3.0 * sh4,          # j4
        -6.0 * (sh4 * sh),  # j5
        -(sh3 * sh3),       # j6
    ], axis=0)              # (8, b_pad)

    # -- v7x: guarantee >= 2 parallel grid steps when the shapes allow it -----
    if (n_pad // tile_n) == 1 and (b_pad // tile_b) == 1:
        if tile_b % 256 == 0:
            tile_b //= 2
        elif tile_n % 16 == 0:
            tile_n //= 2

    out = pl.pallas_call(
        _triweight_attention_kernel,
        out_shape=jax.ShapeDtypeStruct((n_pad, b_pad), jnp.float32),
        grid_spec=pltpu.PrefetchScalarGridSpec(
            num_scalar_prefetch=0,
            grid=(n_pad // tile_n, b_pad // tile_b),
            in_specs=[
                pl.BlockSpec((tile_n, 4), lambda i, j: (i, 0)),
                pl.BlockSpec((8, tile_b), lambda i, j: (0, j)),
            ],
            out_specs=pl.BlockSpec((tile_n, tile_b), lambda i, j: (i, j)),
        ),
        compiler_params=pltpu.CompilerParams(
            dimension_semantics=("parallel", "parallel"),
            vmem_limit_bytes=32 * 1024 * 1024),
    )(row_params, basis_params)
    return out[:n, :b]


def continuous_triweight_reference(theta, psi_mu, psi_sigma):
    """Pure-JAX reference (independent L-moment form), for validation."""
    theta = theta.astype(jnp.float32)
    sigma_sq = -0.5 / theta[:, 1:2]
    mu = theta[:, 0:1] * sigma_sq
    a = _A_CONST * sigma_sq ** (3.0 / 7.0)
    c = 1.0 / (216.0 * sigma_sq ** 3)
    m = psi_mu[None, :] - mu
    s = jnp.broadcast_to(psi_sigma[None, :], m.shape)
    alpha = (-a - m) / s
    beta = (a - m) / s
    phi_a = _INV_SQRT_2PI * jnp.exp(-0.5 * alpha ** 2)
    phi_b = _INV_SQRT_2PI * jnp.exp(-0.5 * beta ** 2)
    i0 = 0.5 * (lax.erf(beta * _INV_SQRT_2) - lax.erf(alpha * _INV_SQRT_2))
    i1 = phi_a - phi_b
    i2 = i0 + alpha * phi_a - beta * phi_b
    i3 = 2 * i1 + alpha ** 2 * phi_a - beta ** 2 * phi_b
    i4 = 3 * i2 + alpha ** 3 * phi_a - beta ** 3 * phi_b
    i5 = 4 * i3 + alpha ** 4 * phi_a - beta ** 4 * phi_b
    i6 = 5 * i4 + alpha ** 5 * phi_a - beta ** 5 * phi_b
    L0 = i0
    L2 = m ** 2 * i0 + 2 * m * s * i1 + s ** 2 * i2
    L4 = (m ** 4 * i0 + 4 * m ** 3 * s * i1 + 6 * m ** 2 * s ** 2 * i2
          + 4 * m * s ** 3 * i3 + s ** 4 * i4)
    L6 = (m ** 6 * i0 + 6 * m ** 5 * s * i1 + 15 * m ** 4 * s ** 2 * i2
          + 20 * m ** 3 * s ** 3 * i3 + 15 * m ** 2 * s ** 4 * i4
          + 6 * m * s ** 5 * i5 + s ** 6 * i6)
    return c * (a ** 6 * L0 - 3 * a ** 4 * L2 + 3 * a ** 2 * L4 - L6)


class ContinuousTriweight:
    """Mirror of the PyTorch module (forward only).

    `psi` is a list of basis-function groups; each group is (mu_j, sigma_j)
    arrays. The per-group loop + cumsum offsets of the original forward are
    equivalent to concatenating the groups along the basis axis.
    """

    def __init__(self, psi):
        self.psi = psi
        self.alpha = 4.0 / 3.0
        self._psi_mu = jnp.concatenate([g[0] for g in psi], axis=0)
        self._psi_sigma = jnp.concatenate([g[1] for g in psi], axis=0)

    def __call__(self, theta):
        # TODO(synk): backward (attention_gradient / Jacobian) not implemented;
        # only the forward pass is exposed as a Pallas kernel.
        return continuous_triweight_pallas(theta, self._psi_mu, self._psi_sigma)


def _make_example(key, n, group_sizes):
    k_mu, k_var = jax.random.split(key)
    mu_true = jax.random.uniform(k_mu, (n,), minval=0.1, maxval=0.9)
    sigma_sq_true = jax.random.uniform(k_var, (n,), minval=0.01, maxval=0.05)
    theta = jnp.stack(
        [mu_true / sigma_sq_true, -0.5 / sigma_sq_true], axis=1
    ).astype(jnp.float32)
    psi = []
    for gi, gsz in enumerate(group_sizes):
        psi.append((jnp.linspace(0.0, 1.0, gsz, dtype=jnp.float32),
                    jnp.full((gsz,), 0.10 / (gi + 1), dtype=jnp.float32)))
    return theta, psi


if __name__ == "__main__":
    key = jax.random.PRNGKey(0)
    k1, k2 = jax.random.split(key)

    ok = True

    # Case 1: N = 16 samples, two groups of 8 Gaussian RBF basis functions.
    theta1, psi1 = _make_example(k1, 16, (8, 8))
    mod1 = ContinuousTriweight(psi1)
    r1 = jax.block_until_ready(mod1(theta1))
    r1_ref = continuous_triweight_reference(theta1, mod1._psi_mu, mod1._psi_sigma)
    ok &= (r1.shape == (16, 16))
    ok &= bool(jnp.isfinite(r1).all())
    ok &= bool(jnp.allclose(r1, r1_ref, rtol=2e-3, atol=2e-3))

    # Case 2: odd sizes (exercise row/lane padding): N = 24, groups of 5 and 7.
    theta2, psi2 = _make_example(k2, 24, (5, 7))
    mod2 = ContinuousTriweight(psi2)
    r2 = jax.block_until_ready(mod2(theta2))
    r2_ref = continuous_triweight_reference(theta2, mod2._psi_mu, mod2._psi_sigma)
    ok &= (r2.shape == (24, 12))
    ok &= bool(jnp.isfinite(r2).all())
    ok &= bool(jnp.allclose(r2, r2_ref, rtol=2e-3, atol=2e-3))

    assert ok
    print("KERNEL_OK")
</pallas_src>

<mosaic_0001>
module attributes {stable_mosaic.version = 11 : i64} {
  func.func @_triweight_attention_kernel(%arg0: i32, %arg1: i32, %arg2: memref<8x4xf32, #tpu.memory_space<vmem>>, %arg3: memref<8x128xf32, #tpu.memory_space<vmem>>, %arg4: memref<8x128xf32, #tpu.memory_space<vmem>>) attributes {dimension_semantics = [#tpu.dimension_semantics<parallel>, #tpu.dimension_semantics<parallel>], iteration_bounds = array<i64: 2, 1>, scalar_prefetch = 0 : i64, scratch_operands = 0 : i64, tpu.core_type = #tpu.core_type<tc>, window_params = [{transform_indices = @transform_0, window_bounds = array<i64: 8, 4>}, {transform_indices = @transform_1, window_bounds = array<i64: 8, 128>}, {transform_indices = @transform_2, window_bounds = array<i64: 8, 128>}]} {
    %c0 = arith.constant 0 : index
    %c0_0 = arith.constant 0 : index
    %0 = vector.load %arg2[%c0, %c0_0] : memref<8x4xf32, #tpu.memory_space<vmem>>, vector<8x4xf32>
    %1 = vector.extract_strided_slice %0 {offsets = [0, 0], sizes = [8, 1], strides = [1, 1]} : vector<8x4xf32> to vector<8x1xf32>
    %2 = vector.extract_strided_slice %0 {offsets = [0, 1], sizes = [8, 1], strides = [1, 1]} : vector<8x4xf32> to vector<8x1xf32>
    %3 = vector.extract_strided_slice %0 {offsets = [0, 2], sizes = [8, 1], strides = [1, 1]} : vector<8x4xf32> to vector<8x1xf32>
    %4 = vector.extract_strided_slice %0 {offsets = [0, 3], sizes = [8, 1], strides = [1, 1]} : vector<8x4xf32> to vector<8x1xf32>
    %c0_1 = arith.constant 0 : index
    %c0_2 = arith.constant 0 : index
    %5 = vector.load %arg3[%c0_1, %c0_2] : memref<8x128xf32, #tpu.memory_space<vmem>>, vector<8x128xf32>
    %6 = vector.extract_strided_slice %5 {offsets = [0, 0], sizes = [1, 128], strides = [1, 1]} : vector<8x128xf32> to vector<1x128xf32>
    %7 = vector.extract_strided_slice %5 {offsets = [1, 0], sizes = [1, 128], strides = [1, 1]} : vector<8x128xf32> to vector<1x128xf32>
    %8 = vector.extract_strided_slice %5 {offsets = [2, 0], sizes = [1, 128], strides = [1, 1]} : vector<8x128xf32> to vector<1x128xf32>
    %9 = vector.extract_strided_slice %5 {offsets = [3, 0], sizes = [1, 128], strides = [1, 1]} : vector<8x128xf32> to vector<1x128xf32>
    %10 = vector.extract_strided_slice %5 {offsets = [4, 0], sizes = [1, 128], strides = [1, 1]} : vector<8x128xf32> to vector<1x128xf32>
    %11 = vector.extract_strided_slice %5 {offsets = [5, 0], sizes = [1, 128], strides = [1, 1]} : vector<8x128xf32> to vector<1x128xf32>
    %12 = vector.extract_strided_slice %5 {offsets = [6, 0], sizes = [1, 128], strides = [1, 1]} : vector<8x128xf32> to vector<1x128xf32>
    %13 = vector.extract_strided_slice %5 {offsets = [7, 0], sizes = [1, 128], strides = [1, 1]} : vector<8x128xf32> to vector<1x128xf32>
    %14 = vector.broadcast %6 : vector<1x128xf32> to vector<8x128xf32>
    %15 = vector.broadcast %1 : vector<8x1xf32> to vector<8x128xf32>
    %16 = arith.subf %14, %15 : vector<8x128xf32>
    %17 = vector.broadcast %2 : vector<8x1xf32> to vector<8x128xf32>
    %18 = arith.addf %17, %16 : vector<8x128xf32>
    %19 = vector.broadcast %7 : vector<1x128xf32> to vector<8x128xf32>
    %20 = arith.mulf %18, %19 : vector<8x128xf32>
    %21 = vector.broadcast %2 : vector<8x1xf32> to vector<8x128xf32>
    %22 = arith.subf %16, %21 : vector<8x128xf32>
    %23 = vector.broadcast %7 : vector<1x128xf32> to vector<8x128xf32>
    %24 = arith.mulf %22, %23 : vector<8x128xf32>
    %25 = arith.mulf %20, %20 : vector<8x128xf32>
    %cst = arith.constant 0.000000e+00 : f32
    %26 = vector.broadcast %cst : f32 to vector<8x128xf32>
    %27 = arith.subf %26, %25 : vector<8x128xf32>
    %28 = math.exp %27 : vector<8x128xf32>
    %cst_3 = arith.constant 0.282094806 : f32
    %29 = vector.broadcast %cst_3 : f32 to vector<8x128xf32>
    %30 = arith.mulf %29, %28 : vector<8x128xf32>
    %31 = arith.mulf %24, %24 : vector<8x128xf32>
    %cst_4 = arith.constant 0.000000e+00 : f32
    %32 = vector.broadcast %cst_4 : f32 to vector<8x128xf32>
    %33 = arith.subf %32, %31 : vector<8x128xf32>
    %34 = math.exp %33 : vector<8x128xf32>
    %cst_5 = arith.constant 0.282094806 : f32
    %35 = vector.broadcast %cst_5 : f32 to vector<8x128xf32>
    %36 = arith.mulf %35, %34 : vector<8x128xf32>
    %37 = math.erf %24 : vector<8x128xf32>
    %38 = math.erf %20 : vector<8x128xf32>
    %39 = arith.subf %37, %38 : vector<8x128xf32>
    %cst_6 = arith.constant 5.000000e-01 : f32
    %40 = vector.broadcast %cst_6 : f32 to vector<8x128xf32>
    %41 = arith.mulf %40, %39 : vector<8x128xf32>
    %42 = arith.subf %30, %36 : vector<8x128xf32>
    %43 = arith.mulf %16, %16 : vector<8x128xf32>
    %44 = vector.broadcast %3 : vector<8x1xf32> to vector<8x128xf32>
    %45 = arith.subf %44, %43 : vector<8x128xf32>
    %cst_7 = arith.constant 4.000000e+00 : f32
    %46 = vector.broadcast %cst_7 : f32 to vector<8x128xf32>
    %47 = arith.mulf %46, %43 : vector<8x128xf32>
    %48 = arith.subf %45, %47 : vector<8x128xf32>
    %49 = arith.mulf %45, %45 : vector<8x128xf32>
    %50 = arith.mulf %49, %45 : vector<8x128xf32>
    %51 = arith.mulf %50, %41 : vector<8x128xf32>
    %52 = arith.mulf %16, %49 : vector<8x128xf32>
    %53 = vector.broadcast %8 : vector<1x128xf32> to vector<8x128xf32>
    %54 = arith.mulf %53, %52 : vector<8x128xf32>
    %55 = arith.mulf %54, %42 : vector<8x128xf32>
    %56 = arith.addf %51, %55 : vector<8x128xf32>
    %57 = arith.mulf %20, %30 : vector<8x128xf32>
    %58 = arith.mulf %24, %36 : vector<8x128xf32>
    %cst_8 = arith.constant 5.000000e-01 : f32
    %59 = vector.broadcast %cst_8 : f32 to vector<8x128xf32>
    %60 = arith.mulf %59, %41 : vector<8x128xf32>
    %61 = arith.subf %57, %58 : vector<8x128xf32>
    %62 = arith.addf %60, %61 : vector<8x128xf32>
    %63 = arith.mulf %45, %48 : vector<8x128xf32>
    %64 = vector.broadcast %9 : vector<1x128xf32> to vector<8x128xf32>
    %65 = arith.mulf %64, %63 : vector<8x128xf32>
    %66 = arith.mulf %65, %62 : vector<8x128xf32>
    %67 = arith.addf %56, %66 : vector<8x128xf32>
    %68 = arith.mulf %20, %57 : vector<8x128xf32>
    %69 = arith.mulf %24, %58 : vector<8x128xf32>
    %70 = arith.subf %68, %69 : vector<8x128xf32>
    %71 = arith.addf %42, %70 : vector<8x128xf32>
    %cst_9 = arith.constant 5.000000e+00 : f32
    %72 = vector.broadcast %cst_9 : f32 to vector<8x128xf32>
    %73 = arith.mulf %72, %45 : vector<8x128xf32>
    %74 = arith.addf %73, %48 : vector<8x128xf32>
    %75 = arith.mulf %16, %74 : vector<8x128xf32>
    %76 = vector.broadcast %10 : vector<1x128xf32> to vector<8x128xf32>
    %77 = arith.mulf %76, %75 : vector<8x128xf32>
    %78 = arith.mulf %77, %71 : vector<8x128xf32>
    %79 = arith.addf %67, %78 : vector<8x128xf32>
    %80 = arith.mulf %20, %68 : vector<8x128xf32>
    %81 = arith.mulf %24, %69 : vector<8x128xf32>
    %cst_10 = arith.constant 1.500000e+00 : f32
    %82 = vector.broadcast %cst_10 : f32 to vector<8x128xf32>
    %83 = arith.mulf %82, %62 : vector<8x128xf32>
    %84 = arith.subf %80, %81 : vector<8x128xf32>
    %85 = arith.addf %83, %84 : vector<8x128xf32>
    %86 = vector.broadcast %11 : vector<1x128xf32> to vector<8x128xf32>
    %87 = arith.mulf %86, %48 : vector<8x128xf32>
    %88 = arith.mulf %87, %85 : vector<8x128xf32>
    %89 = arith.addf %79, %88 : vector<8x128xf32>
    %90 = arith.mulf %20, %80 : vector<8x128xf32>
    %91 = arith.mulf %24, %81 : vector<8x128xf32>
    %cst_11 = arith.constant 2.000000e+00 : f32
    %92 = vector.broadcast %cst_11 : f32 to vector<8x128xf32>
    %93 = arith.mulf %92, %71 : vector<8x128xf32>
    %94 = arith.subf %90, %91 : vector<8x128xf32>
    %95 = arith.addf %93, %94 : vector<8x128xf32>
    %96 = vector.broadcast %12 : vector<1x128xf32> to vector<8x128xf32>
    %97 = arith.mulf %96, %16 : vector<8x128xf32>
    %98 = arith.mulf %97, %95 : vector<8x128xf32>
    %99 = arith.addf %89, %98 : vector<8x128xf32>
    %100 = arith.mulf %20, %90 : vector<8x128xf32>
    %101 = arith.mulf %24, %91 : vector<8x128xf32>
    %cst_12 = arith.constant 2.500000e+00 : f32
    %102 = vector.broadcast %cst_12 : f32 to vector<8x128xf32>
    %103 = arith.mulf %102, %85 : vector<8x128xf32>
    %104 = arith.subf %100, %101 : vector<8x128xf32>
    %105 = arith.addf %103, %104 : vector<8x128xf32>
    %106 = vector.broadcast %13 : vector<1x128xf32> to vector<8x128xf32>
    %107 = arith.mulf %106, %105 : vector<8x128xf32>
    %108 = arith.addf %99, %107 : vector<8x128xf32>
    %109 = vector.broadcast %4 : vector<8x1xf32> to vector<8x128xf32>
    %110 = arith.mulf %109, %108 : vector<8x128xf32>
    %c0_13 = arith.constant 0 : index
    %c0_14 = arith.constant 0 : index
    %111 = vector.load %arg4[%c0_13, %c0_14] : memref<8x128xf32, #tpu.memory_space<vmem>>, vector<8x128xf32>
    tpu.vector_store %arg4[%c0_13, %c0_14], %110 {strides = array<i32>} : memref<8x128xf32, #tpu.memory_space<vmem>>, vector<8x128xf32>,
    return
  }
  func.func @transform_0(%arg0: i32, %arg1: i32) -> (i32, i32) {
    %c0_i32 = arith.constant 0 : i32
    %c0_i32_0 = arith.constant 0 : i32
    return %arg0, %c0_i32 : i32, i32
  }
  func.func @transform_1(%arg0: i32, %arg1: i32) -> (i32, i32) {
    %c0_i32 = arith.constant 0 : i32
    %c0_i32_0 = arith.constant 0 : i32
    return %c0_i32, %arg1 : i32, i32
  }
  func.func @transform_2(%arg0: i32, %arg1: i32) -> (i32, i32) {
    %c0_i32 = arith.constant 0 : i32
    return %arg0, %arg1 : i32, i32
  }
}

</mosaic_0001>

<bundles_post_ra>
// kernel: tpu_custom_call.1
= control target key start
LH: loop header
LB: loop body
LE: loop exit
PB: predicated region body
PF: predicated region fallthrough
CT: control target
= control target key end

     0   :  { %7 = vsyncpa [#allocation3], 0  ;;  %s782_s0 = inlined_call_operand.vmem [shape: f32[16,4], index: 0, kind: input, shape index: {}]   ;;  %s783_s1 = inlined_call_operand.vmem [shape: f32[8,128], index: 1, kind: input, shape index: {}]   ;;  %s784_s2 = inlined_call_operand.hbm [shape: f32[16,128], index: 2, kind: output, shape index: {}]  }
   0x1   :  { %9 = vsyncpa [#allocation3 + $0x1], 0  ;;  %s635_s9 = smov 0   ;;  %s637_s10 = smov 0  }
   0x2   :  { %s639_s11 = smov 0   ;;  %s641_s12 = smov 0  }
   0x3   :  { %s643_s13 = smov 0   ;;  %s645_s14 = smov 0  }
   0x4 LB: > { %s450_s15 = sadd.s32 4294967295, %s614_s14   ;;  %s451_s16 = sadd.s32 4294967294, %s614_s14   ;;  %s614_s14 = sphi %s645_s14, %s15_s14   ;;  %s610_s13 = sphi %s643_s13, %s791_s13   ;;  %s606_s12 = sphi %s641_s12, %s790_s12   ;;  %s602_s11 = sphi %s639_s11, %s789_s11   ;;  %s598_s10 = sphi %s637_s10, %s788_s10   ;;  %s594_s9 = sphi %s635_s9, %s787_s9  }
   0x5   : > { %s27_s17 = sadd.s32 1, %s610_s13  ;;  %s88_s18 = sadd.s32 1, %s602_s11 }
   0x6   : > { %p29_p0 = scmp.ge.s32.totalorder %s27_s17, 2  ;;  %p98_p1 = scmp.ne.s32.totalorder %s602_s11, %s598_s10 }
   0x7   : > { %p99_p2 = scmp.eq.s32.totalorder %s450_s15, 1  ;;  %p104_p3 = scmp.ne.s32.totalorder %s598_s10, %s594_s9 }
   0x8   : > { %s793_s17 = smov (%p29_p0, %s27_s17), 0  ;;  %p105_p5 = scmp.eq.s32.totalorder %s451_s16, 1 }
   0x9   : > { %p675_p4 = por %p99_p2, %p98_p1  ;;  %s83_s20 = ssub.s32 %s610_s13, %s793_s17 }
   0xa   : > { %p455_p6 = scmp.ge.s32.totalorder %s614_s14, 1  ;;  %p86_p7 = scmp.eq.s32.totalorder %s83_s20, 0 }
   0xb   : > { %p682_p8 = por %p105_p5, %p104_p3  ;;  %p137_p9 = scmp.lt.s32.totalorder %s614_s14, 3 }
   0xc   : > { %s688_s22 = scalar_select %p86_p7, %s602_s11, %s88_s18  }
   0xd   : > { %p138_p10 = pnand %p455_p6, %p137_p9 }
   0xe   : > { %p162_p11 = scmp.lt.s32.totalorder (!%p138_p10), %s606_s12, 1  ;;  %s159_s30 = sand.u32 (!%p138_p10), 1, %s598_s10  }
   0xf   : > { %141 = sbr.rel (%p138_p10) target bundleno = 224 (0xe0), region = 28  ;;  %s456_s3 = sshll.u32 (!%p138_p10), %s159_s30, 3 }
  0x10   : > { %s461_s4 = sshll.u32 (!%p138_p10), %s606_s12, 3  ;;  %s161_s8 = scalar_lea.vmem (!%p138_p10), [#allocation2], %s456_s3 }
  0x11   : > { %s362_s7 = scalar_lea.hbm (!%p138_p10), %s784_s2, %s461_s4  ;;  %s364_s15 = sshll.u32 (!%p138_p10), %s161_s8, 4  ;;  %s365_s15 = int_to_ptr.vmem [resolvable:$true] %s364_s15 }
  0x12   : > { %s366_s16 = sshll.u32 (!%p138_p10), %s362_s7, 4  ;;  %s556_s25 = scalar_lea.hbm (!%p138_p10), %s784_s2, 16  ;;  %s367_s16 = int_to_ptr.hbm [resolvable:$true] %s366_s16 }
  0x13   : > { %s550_s18 = sshra.s32 (!%p138_p10), %s367_s16, 4  ;;  %s551_s18 = int_to_ptr.hbm [resolvable:$true] %s550_s18 }
  0x14   : > { %v616_v0 = vmov 0   ;;  %v617_v1 = vmov 2   ;;  %s163_s23 = scalar_select %p162_p11, %s606_s12, 1  ;;  %v618_v3 = vmov 1   ;;  %v619_v4 = vmov 3   ;;  %v698_v6 = vld [vmem:[%s783_s1] sm:$0xff] }
  0x15   : > { %523 = vset.pattern.permute.xlu0 %v616_v0  ;;  %525 = vset.pattern.permute.xlu1 %v617_v1  ;;  %v172_v7 = vperm.slane %v698_v6, 0  ;;  %v184_v9 = vperm.slane %v698_v6, 1  ;;  %s351_s12 = scalar_lea.sflag [#allocation3], %s159_s30  ;;  %s552_s20 = scalar_lea.hbm %s551_s18, 8 }
  0x16   : > { %s457_s24 = sshll.u32 %s163_s23, 3  ;;  %p553_p12 = scmp.ne.s32.totalorder %s551_s18, %s552_s20 }
  0x17   : > { %s165_s27 = scalar_lea.vmem %s782_s0, %s457_s24  ;;  %p557_p1 = scmp.lt.s32.totalorder %s551_s18, %s784_s2 }
  0x18   : > { %v170_v2 = vld [vmem:[%s165_s27] sm:$0xff]  ;;  %p554_p13 = pnand %p553_p12, %p675_p4  ;;  %p558_p2 = scmp.lt.s32.totalorder %s556_s25, %s552_s20 }
  0x19   : > { %175 = vperm.xlu0 %523, %v170_v2   ;;  %283 = vperm.xlu1 %525, %v170_v2  }
  0x1a   : > { %p555_p0 = pneg %p554_p13  ;;  %p559_p3 = por %p558_p2, %p557_p1 }
  0x1c   : > { %p560_p5 = pnand %p559_p3, %p555_p0 }
  0x21   : > { %524 = vset.pattern.permute.xlu0 %v618_v3  ;;  %526 = vset.pattern.permute.xlu1 %v619_v4 }
  0x22   : > { %180 = vperm.xlu0 %524, %v170_v2   ;;  %345 = vperm.xlu1 %526, %v170_v2  }
  0x2a   : > { %527 = vset.pattern.permute.xlu0 %v619_v4 }
  0x8b   : > { %v176_v5 = vpop.permute.xlu0 %175  ;;  %v284_v0 = vpop.permute.xlu1 %283 }
  0x8c   : > { %v701_v8 = vsub.f32 %v172_v7, %v176_v5 }
  0x8e   : > { %v281_v61 = vmul.f32 %v701_v8, %v701_v8 }
  0x94   : > { %v181_v10 = vpop.permute.xlu0 %180 }
  0x95   : > { %v183_v11 = vadd.f32 %v181_v10, %v701_v8  ;;  %v186_v12 = vsub.f32 %v701_v8, %v181_v10 }
  0x97   : > { %v706_v13 = vmul.f32 %v184_v9, %v183_v11  ;;  %v708_v14 = vmul.f32 %v186_v12, %v184_v9  ;;  %v286_v9 = vsub.f32 %v284_v0, %v281_v61 }
  0x99   : > { %v188_v15 = vmul.f32 %v706_v13, %v706_v13  ;;  %v193_v16 = vmul.f32 %v708_v14, %v708_v14 }
  0x9b   : > { %v199_v17 = vmin.f32 %v193_v16, 16.0  ;;  %v239_v18 = vmin.f32 %v188_v15, 16.0  ;;  %v189_v34 = vsub.f32 0.0, %v188_v15  ;;  %v194_v38 = vsub.f32 0.0, %v193_v16 }
  0x9d   : > { %v200_v19 = vmul.f32 2.1237322e-06, %v199_v17  ;;  %v211_v20 = vmul.f32 3.8918573e-05, %v199_v17  ;;  %v240_v21 = vmul.f32 2.1237322e-06, %v239_v18 }
  0x9e   : > { %v251_v22 = vmul.f32 3.8918573e-05, %v239_v18  ;;  %v190_v42 = vmul.f32 1.442695, %v189_v34  ;;  %v195_v46 = vmul.f32 1.442695, %v194_v38 }
  0x9f   : > { %v201_v23 = vadd.f32 0.00028619796, %v200_v19  ;;  %v212_v24 = vadd.f32 0.001143296, %v211_v20  ;;  %v241_v25 = vadd.f32 0.00028619796, %v240_v21 }
  0xa0   : > { %v252_v26 = vadd.f32 0.001143296, %v251_v22  ;;  %528 = vpow2.f32 %v190_v42 }
  0xa1   : > { %v202_v27 = vmul.f32 %v201_v23, %v199_v17  ;;  %v213_v28 = vmul.f32 %v212_v24, %v199_v17  ;;  %v242_v29 = vmul.f32 %v241_v25, %v239_v18  ;;  %530 = vpow2.f32 %v195_v46 }
  0xa2   : > { %v253_v30 = vmul.f32 %v252_v26, %v239_v18 }
  0xa3   : > { %v203_v31 = vadd.f32 0.0036580483, %v202_v27  ;;  %v214_v32 = vadd.f32 0.014752088, %v213_v28  ;;  %v243_v36 = vadd.f32 0.0036580483, %v242_v29 }
  0xa4   : > { %v254_v33 = vadd.f32 0.014752088, %v253_v30 }
  0xa5   : > { %v215_v35 = vmul.f32 %v214_v32, %v199_v17  ;;  %v204_v39 = vmul.f32 %v203_v31, %v199_v17  ;;  %v244_v44 = vmul.f32 %v243_v36, %v239_v18 }
  0xa6   : > { %v255_v37 = vmul.f32 %v254_v33, %v239_v18  ;;  %v529_v57 = vpop.eup %528 }
  0xa7   : > { %v216_v40 = vadd.f32 0.112945676, %v215_v35  ;;  %v205_v47 = vadd.f32 0.05243302, %v204_v39  ;;  %v245_v51 = vadd.f32 0.05243302, %v244_v44  ;;  %v531_v59 = vpop.eup %530 }
  0xa8   : > { %v256_v41 = vadd.f32 0.112945676, %v255_v37  ;;  %v192_v62 = vmul.f32 0.2820948, %v529_v57  ;;  %v197_v1 = vmul.f32 0.2820948, %v531_v59 }
  0xa9   : > { %v217_v43 = vmul.f32 %v216_v40, %v199_v17  ;;  %v206_v53 = vmul.f32 %v205_v47, %v199_v17  ;;  %v246_v56 = vmul.f32 %v245_v51, %v239_v18  ;;  %v311_v37 = vmul.f32 5.0, %v286_v9 }
  0xaa   : > { %v257_v45 = vmul.f32 %v256_v41, %v239_v18  ;;  %v717_v11 = vmul.f32 %v192_v62, %v706_v13  ;;  %v298_v19 = vmul.f32 %v197_v1, %v708_v14  ;;  %v289_v40 = vmul.f32 %v286_v9, %v286_v9 }
  0xab   : > { %v218_v48 = vadd.f32 0.4994258, %v217_v43  ;;  %v207_v58 = vadd.f32 0.18741608, %v206_v53  ;;  %v247_v60 = vadd.f32 0.18741608, %v246_v56  ;;  %v280_v51 = vsub.f32 %v192_v62, %v197_v1 }
  0xac   : > { %v258_v49 = vadd.f32 0.4994258, %v257_v45  ;;  %v307_v26 = vmul.f32 %v717_v11, %v706_v13  ;;  %v308_v29 = vmul.f32 %v298_v19, %v708_v14  ;;  %v290_v53 = vmul.f32 %v289_v40, %v286_v9 }
  0xad   : > { %v219_v50 = vmul.f32 %v218_v48, %v199_v17  ;;  %v208_v2 = vmul.f32 %v207_v58, %v199_v17  ;;  %v248_v5 = vmul.f32 %v247_v60, %v239_v18  ;;  %v292_v48 = vmul.f32 %v289_v40, %v701_v8 }
  0xae   : > { %v259_v52 = vmul.f32 %v258_v49, %v239_v18  ;;  %v287_v18 = vmul.f32 4.0, %v281_v61  ;;  %v309_v44 = vsub.f32 %v307_v26, %v308_v29  ;;  %v318_v45 = vmul.f32 %v307_v26, %v706_v13 }
  0xaf   : > { %v220_v54 = vadd.f32 1.0, %v219_v50  ;;  %v209_v12 = vadd.f32 1.1283791, %v208_v2  ;;  %v249_v23 = vadd.f32 1.1283791, %v248_v5  ;;  %v319_v46 = vmul.f32 %v308_v29, %v708_v14 }
  0xb0   : > { %v260_v55 = vadd.f32 1.0, %v259_v52  ;;  %v288_v36 = vsub.f32 %v286_v9, %v287_v18  ;;  %v293_v49 = vperm.slane %v698_v6, 2  ;;  %v303_v52 = vperm.slane %v698_v6, 3 }
  0xb1   : > { %532 = vrcp.f32 %v220_v54  ;;  %v232_v15 = vand.u32 2147483648, %v220_v54  ;;  %v230_v21 = vand.u32 2147483647, %v220_v54  ;;  %vm226_vm2 = vweird.f32 %v220_v54 }
  0xb2   : > { %534 = vrcp.f32 %v260_v55  ;;  %v272_v22 = vand.u32 2147483648, %v260_v55  ;;  %v270_v24 = vand.u32 2147483647, %v260_v55  ;;  %vm266_vm4 = vweird.f32 %v260_v55 }
  0xb3   : > { %v233_v27 = vor.u32 1.1754944e-38, %v232_v15  ;;  %v210_v30 = vmul.f32 %v209_v12, %v708_v14  ;;  %vm231_vm5 = vcmp.eq.f32.partialorder %v230_v21, 8.507059e+37  ;;  %v250_v34 = vmul.f32 %v249_v23, %v706_v13 }
  0xb4   : > { %v273_v32 = vor.u32 1.1754944e-38, %v272_v22  ;;  %vm271_vm7 = vcmp.eq.f32.partialorder %v270_v24, 8.507059e+37  ;;  %v312_v47 = vadd.f32 %v311_v37, %v288_v36  ;;  %v310_v56 = vadd.f32 %v309_v44, %v280_v51 }
  0xb5   : > { %v327_v57 = vmul.f32 %v318_v45, %v706_v13  ;;  %v328_v58 = vmul.f32 %v319_v46, %v708_v14  ;;  %v314_v60 = vperm.slane %v698_v6, 4  ;;  %v300_v62 = vsub.f32 %v717_v11, %v298_v19 }
  0xb6   : > { %v313_v59 = vmul.f32 %v312_v47, %v701_v8  ;;  %v323_v2 = vperm.slane %v698_v6, 5  ;;  %v329_v5 = vmul.f32 2.0, %v310_v56  ;;  %v321_v12 = vsub.f32 %v318_v45, %v319_v46 }
  0xb7   : > { %v533_v63 = vpop.eup %532  ;;  %v336_v15 = vmul.f32 %v327_v57, %v706_v13  ;;  %v337_v11 = vmul.f32 %v328_v58, %v708_v14  ;;  %v341_v18 = vperm.slane %v698_v6, 7 }
  0xb8   : > { %v535_v3 = vpop.eup %534  ;;  %v222_v4 = vmul.f32 %v533_v63, %v220_v54  ;;  %vm227_vm0 = vweird.f32 %v533_v63  ;;  %v302_v54 = vmul.f32 %v288_v36, %v286_v9  ;;  %v332_v9 = vperm.slane %v698_v6, 6 }
  0xb9   : > { %v262_v7 = vmul.f32 %v535_v3, %v260_v55  ;;  %vm267_vm1 = vweird.f32 %v535_v3  ;;  %vm228_vm3 = vmor %vm226_vm2, %vm227_vm0  ;;  %v324_v19 = vmul.f32 %v323_v2, %v288_v36 }
  0xba   : > { %v223_v10 = vsub.f32 1.0, %v222_v4  ;;  %vm268_vm6 = vmor %vm266_vm4, %vm267_vm1  ;;  %v304_v1 = vmul.f32 %v303_v52, %v302_v54 }
  0xbb   : > { %v263_v16 = vsub.f32 1.0, %v262_v7  ;;  %v330_v7 = vsub.f32 %v327_v57, %v328_v58 }
  0xbc   : > { %v224_v20 = vmul.f32 %v533_v63, %v223_v10  ;;  %v315_v10 = vmul.f32 %v314_v60, %v313_v59 }
  0xbd   : > { %v264_v17 = vmul.f32 %v535_v3, %v263_v16  ;;  %v331_v24 = vadd.f32 %v330_v7, %v329_v5 }
  0xbe   : > { %v225_v25 = vadd.f32 %v533_v63, %v224_v20  ;;  %v316_v23 = vmul.f32 %v315_v10, %v310_v56 }
  0xbf   : > { %v265_v28 = vadd.f32 %v535_v3, %v264_v17 }
  0xc0   : > { %v229_v31 = vsel %vm228_vm3, %v533_v63, %v225_v25  ;;  %v294_v63 = vmul.f32 %v293_v49, %v292_v48  ;;  %v333_v25 = vmul.f32 %v332_v9, %v701_v8 }
  0xc1   : > { %v234_v33 = vsel %vm231_vm5, %v233_v27, %v229_v31  ;;  %v269_v35 = vsel %vm268_vm6, %v535_v3, %v265_v28  ;;  %v339_v28 = vsub.f32 %v336_v15, %v337_v11 }
  0xc2   : > { %v235_v38 = vmul.f32 %v234_v33, %v210_v30  ;;  %v274_v39 = vsel %vm271_vm7, %v273_v32, %v269_v35  ;;  %v295_v3 = vmul.f32 %v294_v63, %v280_v51  ;;  %v334_v30 = vmul.f32 %v333_v25, %v331_v24  ;;  %v346_v32 = vpop.permute.xlu1 %345 }
  0xc3   : > { %v275_v41 = vmul.f32 %v274_v39, %v250_v34 }
  0xc4   : > { %v458_v42 = vclamps-f32 %v235_v38, 1.0 }
  0xc5   : > { %v459_v43 = vclamps-f32 %v275_v41, 1.0 }
  0xc7   : > { %v278_v50 = vsub.f32 %v458_v42, %v459_v43 }
  0xc9   : > { %v279_v55 = vmul.f32 0.5, %v278_v50 }
  0xcb   : > { %v291_v61 = vmul.f32 %v290_v53, %v279_v55  ;;  %v299_v0 = vmul.f32 0.5, %v279_v55 }
  0xcd   : > { %v301_v4 = vadd.f32 %v300_v62, %v299_v0  ;;  %v296_v16 = vadd.f32 %v295_v3, %v291_v61 }
  0xcf   : > { %v305_v20 = vmul.f32 %v304_v1, %v301_v4  ;;  %v320_v21 = vmul.f32 1.5, %v301_v4 }
  0xd1   : > { %v306_v22 = vadd.f32 %v305_v20, %v296_v16  ;;  %v322_v17 = vadd.f32 %v321_v12, %v320_v21 }
  0xd3   : > { %v317_v26 = vadd.f32 %v316_v23, %v306_v22  ;;  %v325_v13 = vmul.f32 %v324_v19, %v322_v17  ;;  %v338_v27 = vmul.f32 2.5, %v322_v17 }
  0xd5   : > { %v326_v29 = vadd.f32 %v325_v13, %v317_v26  ;;  %v340_v14 = vadd.f32 %v339_v28, %v338_v27 }
  0xd7   : > { %v335_v31 = vadd.f32 %v334_v30, %v326_v29  ;;  %v342_v6 = vmul.f32 %v341_v18, %v340_v14 }
  0xd9   : > { %v343_v8 = vadd.f32 %v342_v6, %v335_v31 }
  0xdb   : > { %v348_v33 = vmul.f32 %v346_v32, %v343_v8 }
  0xdd   : > { %349 = vst [vmem:[%s161_s8] sm:$0xff] %v348_v33 }
  0xde   : > { %563 = shalt.err (!%p560_p5)
}
  0xdf   : > { %464 = dma.vmem_to_hbm [thread:$0]  (%p675_p4), %s365_s15, 128, %s367_s16, %s351_s12  }
  0xe0 PF: > { %p470_p6 = scmp.ge.s32.totalorder %s614_s14, 2  ;;  %s378_s28 = sand.u32 1, %s594_s9  }
  0xe1   : > { %s379_s29 = scalar_lea.sflag [#allocation3], %s378_s28 }
  0xe2   : > { %p467_p7 = pnand %p470_p6, %p682_p8 }
  0xe4   : > { %p468_p9 = pneg %p467_p7 }
  0xe6   : > { %589 = dma.done.wait (%p468_p9), %s379_s29, 128  }
  0xe7   : > { %591 = vsyncadd (%p468_p9), %s379_s29, 4294967168  ;;  %s15_s14 = sadd.s32 1, %s614_s14   ;;  %s787_s9 = smov %s598_s10 }
  0xe8   : > { %p12_p10 = scmp.ge.s32.totalorder %s15_s14, 4   ;;  %s788_s10 = smov %s602_s11 }
  0xe9   : > { %s789_s11 = smov %s688_s22  ;;  %s790_s12 = smov %s610_s13 }
  0xea   : > { %s791_s13 = smov %s793_s17  ;;  %14 = sbr.rel (!%p12_p10) target bundleno = 4 (0x4), region = 66 }
  0xef   :  { %385 = vsyncpa [#allocation3], 1 }
  0xf0   :  { %387 = vsyncpa [#allocation3 + $0x1], 1 }

</bundles_post_ra>
